<compile_context>
chip_gen: v7x
topology: tpu7x:2x2x1
jax: 0.10.0
libtpu: 0.0.40
codegen_flags: <defaults>
</compile_context>

<pallas_src>
import jax
import jax.numpy as jnp
from jax.experimental import pallas as pl
from jax.experimental.pallas import tpu as pltpu

_LANE = 128      # lane width of a vreg (last dim)
_SUBLANE = 8     # sublane count of a vreg (second-to-last dim)


def _round_up(x, m):
    return ((x + m - 1) // m) * m


def _pad2d(a, rows, cols):
    r, c = a.shape
    if r == rows and c == cols:
        return a
    return jnp.pad(a, ((0, rows - r), (0, cols - c)))


def _mlp_kernel(x_ref, w0_ref, w1_ref, w2_ref, o_ref):
    """Whole MLP hot path for one batch tile: two hidden ReLU layers + linear out."""
    x = x_ref[...]                                                      # (TM, din_p)
    h = jnp.dot(x, w0_ref[...], preferred_element_type=jnp.float32)
    h = jnp.maximum(h, 0.0)                                             # ReLU
    h = jnp.dot(h, w1_ref[...], preferred_element_type=jnp.float32)
    h = jnp.maximum(h, 0.0)                                             # ReLU
    out = jnp.dot(h, w2_ref[...], preferred_element_type=jnp.float32)
    o_ref[...] = out.astype(o_ref.dtype)                                # final_act=False


def general_fc_net_forward(tx, w0, w1, w2, *, block_m=2048):
    """Pallas forward of General_FC_net (default config: ReLU MLP, no bias).

    tx : (N, din) float32
    w0 : (din, h1), w1 : (h1, h2), w2 : (h2, dout)  -- (in, out) layout
         (i.e. the transpose of torch's nn.Linear.weight).
    Returns (N, dout) float32.
    """
    n, din = tx.shape
    h1 = w0.shape[1]
    h2 = w1.shape[1]
    dout = w2.shape[1]

    # Lane-dense feature padding (multiples of 128); padded entries are zero so
    # the math is unchanged (ReLU(0) = 0, zero weight rows/cols contribute 0).
    din_p = _round_up(din, _LANE)
    h1_p = _round_up(h1, _LANE)
    h2_p = _round_up(h2, _LANE)
    dout_p = _round_up(dout, _LANE)

    # Batch tile: multiple of 8 sublanes, no larger than the (padded) batch.
    block_m_eff = min(block_m, _round_up(n, _SUBLANE))
    block_m_eff = max(_SUBLANE, _round_up(block_m_eff, _SUBLANE))
    n_p = _round_up(n, block_m_eff)

    x_p = _pad2d(tx.astype(jnp.float32), n_p, din_p)
    w0_p = _pad2d(w0.astype(jnp.float32), din_p, h1_p)
    w1_p = _pad2d(w1.astype(jnp.float32), h1_p, h2_p)
    w2_p = _pad2d(w2.astype(jnp.float32), h2_p, dout_p)

    grid = (n_p // block_m_eff,)

    flops = 2 * n_p * (din_p * h1_p + h1_p * h2_p + h2_p * dout_p)
    bytes_accessed = 4 * (
        n_p * (din_p + dout_p) + din_p * h1_p + h1_p * h2_p + h2_p * dout_p
    )

    out_p = pl.pallas_call(
        _mlp_kernel,
        out_shape=jax.ShapeDtypeStruct((n_p, dout_p), jnp.float32),
        grid_spec=pltpu.PrefetchScalarGridSpec(
            num_scalar_prefetch=0,
            grid=grid,
            in_specs=[
                # batch-tiled, lane-dense input block
                pl.BlockSpec((block_m_eff, din_p), lambda i: (i, 0)),
                # weights: full (padded) arrays, same block every grid step
                # -> DMA'd once, resident in VMEM for the whole grid.
                pl.BlockSpec((din_p, h1_p), lambda i: (0, 0)),
                pl.BlockSpec((h1_p, h2_p), lambda i: (0, 0)),
                pl.BlockSpec((h2_p, dout_p), lambda i: (0, 0)),
            ],
            out_specs=pl.BlockSpec((block_m_eff, dout_p), lambda i: (i, 0)),
        ),
        compiler_params=pltpu.CompilerParams(
            dimension_semantics=("parallel",),
        ),
        cost_estimate=pl.CostEstimate(
            flops=flops, transcendentals=0, bytes_accessed=bytes_accessed
        ),
    )(x_p, w0_p, w1_p, w2_p)

    # Strip batch + output-lane padding.
    return out_p[:n, :dout]


def _init_linear_weight(key, fan_in, fan_out):
    # Deterministic stand-in for nn.Linear's default init: U(-1/sqrt(fan_in), +).
    # Stored as (in, out) so the kernel computes x @ W (== x @ W_torch.T).
    bound = 1.0 / jnp.sqrt(jnp.float32(fan_in))
    return jax.random.uniform(
        key, (fan_in, fan_out), minval=-bound, maxval=bound, dtype=jnp.float32
    )


def _reference_forward(tx, w0, w1, w2):
    h = jnp.maximum(tx @ w0, 0.0)
    h = jnp.maximum(h @ w1, 0.0)
    return h @ w2


if __name__ == "__main__":
    # Synthetic config consistent with the module:
    #   eqn.dim = 4  -> din = dim + 1 = 5, dout = dim = 4
    #   net_config['int_layers'] = [32, 32]
    eqn_dim = 4
    din, dout = eqn_dim + 1, eqn_dim
    int_layers = [32, 32]
    batch = 16

    key = jax.random.PRNGKey(0)
    k_x, k_w0, k_w1, k_w2 = jax.random.split(key, 4)

    tx = jax.random.normal(k_x, (batch, din), dtype=jnp.float32)
    w0 = _init_linear_weight(k_w0, din, int_layers[0])
    w1 = _init_linear_weight(k_w1, int_layers[0], int_layers[1])
    w2 = _init_linear_weight(k_w2, int_layers[1], dout)

    out = general_fc_net_forward(tx, w0, w1, w2)
    out = jax.block_until_ready(out)

    # Correctness check against a pure-JAX reference of the same math.
    ref = jax.block_until_ready(_reference_forward(tx, w0, w1, w2))
    assert out.shape == (batch, dout)
    assert jnp.allclose(out, ref, atol=1e-5, rtol=1e-5), "mismatch vs reference"

    # Second check: non-divisible batch + multi-step grid (exercises batch
    # padding and the pipelined grid path).
    tx2 = jax.random.normal(jax.random.PRNGKey(1), (529, din), dtype=jnp.float32)
    out2 = jax.block_until_ready(
        general_fc_net_forward(tx2, w0, w1, w2, block_m=256)
    )
    ref2 = jax.block_until_ready(_reference_forward(tx2, w0, w1, w2))
    assert out2.shape == (529, dout)
    assert jnp.allclose(out2, ref2, atol=1e-5, rtol=1e-5), "mismatch vs reference (padded batch)"

    print("KERNEL_OK")
</pallas_src>

<mosaic_0001>
module attributes {stable_mosaic.version = 11 : i64} {
  func.func @_mlp_kernel(%arg0: i32, %arg1: memref<16x128xf32, #tpu.memory_space<vmem>>, %arg2: memref<128x128xf32, #tpu.memory_space<vmem>>, %arg3: memref<128x128xf32, #tpu.memory_space<vmem>>, %arg4: memref<128x128xf32, #tpu.memory_space<vmem>>, %arg5: memref<16x128xf32, #tpu.memory_space<vmem>>) attributes {dimension_semantics = [#tpu.dimension_semantics<parallel>], iteration_bounds = array<i64: 1>, scalar_prefetch = 0 : i64, scratch_operands = 0 : i64, tpu.core_type = #tpu.core_type<tc>, window_params = [{transform_indices = @transform_0, window_bounds = array<i64: 16, 128>}, {pipeline_mode = #tpu.pipeline_mode<synchronous>, transform_indices = @transform_1, window_bounds = array<i64: 128, 128>}, {pipeline_mode = #tpu.pipeline_mode<synchronous>, transform_indices = @transform_2, window_bounds = array<i64: 128, 128>}, {pipeline_mode = #tpu.pipeline_mode<synchronous>, transform_indices = @transform_3, window_bounds = array<i64: 128, 128>}, {transform_indices = @transform_4, window_bounds = array<i64: 16, 128>}]} {
    %c0 = arith.constant 0 : index
    %c0_0 = arith.constant 0 : index
    %0 = vector.load %arg1[%c0, %c0_0] : memref<16x128xf32, #tpu.memory_space<vmem>>, vector<16x128xf32>
    %c0_1 = arith.constant 0 : index
    %c0_2 = arith.constant 0 : index
    %1 = vector.load %arg2[%c0_1, %c0_2] : memref<128x128xf32, #tpu.memory_space<vmem>>, vector<128x128xf32>
    %cst = arith.constant dense<0.000000e+00> : vector<16x128xf32>
    %2 = tpu.matmul %0, %1, %cst {dimension_numbers = #tpu.dot_dimension_numbers<[1], [0], [0], [1], [0, 0, 1, 1], [], []>} : vector<16x128xf32>, vector<128x128xf32>, vector<16x128xf32> -> vector<16x128xf32>
    %cst_3 = arith.constant 0.000000e+00 : f32
    %3 = vector.broadcast %cst_3 : f32 to vector<16x128xf32>
    %4 = arith.maximumf %2, %3 : vector<16x128xf32>
    %c0_4 = arith.constant 0 : index
    %c0_5 = arith.constant 0 : index
    %5 = vector.load %arg3[%c0_4, %c0_5] : memref<128x128xf32, #tpu.memory_space<vmem>>, vector<128x128xf32>
    %cst_6 = arith.constant dense<0.000000e+00> : vector<16x128xf32>
    %6 = tpu.matmul %4, %5, %cst_6 {dimension_numbers = #tpu.dot_dimension_numbers<[1], [0], [0], [1], [0, 0, 1, 1], [], []>} : vector<16x128xf32>, vector<128x128xf32>, vector<16x128xf32> -> vector<16x128xf32>
    %cst_7 = arith.constant 0.000000e+00 : f32
    %7 = vector.broadcast %cst_7 : f32 to vector<16x128xf32>
    %8 = arith.maximumf %6, %7 : vector<16x128xf32>
    %c0_8 = arith.constant 0 : index
    %c0_9 = arith.constant 0 : index
    %9 = vector.load %arg4[%c0_8, %c0_9] : memref<128x128xf32, #tpu.memory_space<vmem>>, vector<128x128xf32>
    %cst_10 = arith.constant dense<0.000000e+00> : vector<16x128xf32>
    %10 = tpu.matmul %8, %9, %cst_10 {dimension_numbers = #tpu.dot_dimension_numbers<[1], [0], [0], [1], [0, 0, 1, 1], [], []>} : vector<16x128xf32>, vector<128x128xf32>, vector<16x128xf32> -> vector<16x128xf32>
    %c0_11 = arith.constant 0 : index
    %c0_12 = arith.constant 0 : index
    %11 = vector.load %arg5[%c0_11, %c0_12] : memref<16x128xf32, #tpu.memory_space<vmem>>, vector<16x128xf32>
    tpu.vector_store %arg5[%c0_11, %c0_12], %10 {strides = array<i32>} : memref<16x128xf32, #tpu.memory_space<vmem>>, vector<16x128xf32>,
    return
  }
  func.func @transform_0(%arg0: i32) -> (i32, i32) {
    %c0_i32 = arith.constant 0 : i32
    %c0_i32_0 = arith.constant 0 : i32
    return %arg0, %c0_i32 : i32, i32
  }
  func.func @transform_1(%arg0: i32) -> (i32, i32) {
    %c0_i32 = arith.constant 0 : i32
    %c0_i32_0 = arith.constant 0 : i32
    %c0_i32_1 = arith.constant 0 : i32
    return %c0_i32, %c0_i32_0 : i32, i32
  }
  func.func @transform_2(%arg0: i32) -> (i32, i32) {
    %c0_i32 = arith.constant 0 : i32
    %c0_i32_0 = arith.constant 0 : i32
    %c0_i32_1 = arith.constant 0 : i32
    return %c0_i32, %c0_i32_0 : i32, i32
  }
  func.func @transform_3(%arg0: i32) -> (i32, i32) {
    %c0_i32 = arith.constant 0 : i32
    %c0_i32_0 = arith.constant 0 : i32
    %c0_i32_1 = arith.constant 0 : i32
    return %c0_i32, %c0_i32_0 : i32, i32
  }
  func.func @transform_4(%arg0: i32) -> (i32, i32) {
    %c0_i32 = arith.constant 0 : i32
    %c0_i32_0 = arith.constant 0 : i32
    return %arg0, %c0_i32 : i32, i32
  }
}

</mosaic_0001>

<bundles_post_ra>
// kernel: tpu_custom_call.1
= control target key start
LH: loop header
LB: loop body
LE: loop exit
PB: predicated region body
PF: predicated region fallthrough
CT: control target
= control target key end

     0   :  { %9 = vsyncpa [#allocation3], 0  ;;  %s874_s0 = inlined_call_operand.hbm [shape: f32[16,128], index: 0, kind: input, shape index: {}]   ;;  %s875_s1 = inlined_call_operand.hbm [shape: f32[128,128], index: 1, kind: input, shape index: {}]   ;;  %s876_s2 = inlined_call_operand.hbm [shape: f32[128,128], index: 2, kind: input, shape index: {}]   ;;  %s877_s3 = inlined_call_operand.hbm [shape: f32[128,128], index: 3, kind: input, shape index: {}]   ;;  %s878_s4 = inlined_call_operand.hbm [shape: f32[16,128], index: 4, kind: output, shape index: {}]  }
   0x1   :  { %10 = vsyncpa [#allocation6], 0 }
   0x2   :  { %11 = vsyncpa [#allocation9], 0 }
   0x3   :  { %12 = vsyncpa [#allocation4], 0  ;;  %s753_s15 = smov [#allocation5]   ;;  %s754_s17 = smov [#allocation2]  }
   0x4   :  { %s30_s16 = sshll.u32 %s753_s15, 4  ;;  %s18_s18 = sshll.u32 %s754_s17, 4  ;;  %s31_s16 = int_to_ptr.vmem [resolvable:$true] %s30_s16  ;;  %s785_s18 = int_to_ptr.vmem [resolvable:$true] %s18_s18 }
   0x5   :  { %s635_s21 = scalar_lea.hbm %s875_s1, 2048 }
   0x6   :  { %p636_p0 = scmp.ne.s32.totalorder %s875_s1, %s635_s21  ;;  %p639_p1 = scmp.lt.u32.totalorder %s635_s21, %s875_s1 }
   0x8   :  { %p641_p2 = pnand %p639_p1, %p636_p0 }
   0xa   :  { %644 = shalt.err (!%p641_p2)
}
   0xb   :  { %s645_s26 = scalar_lea.vmem %s31_s16, 2048  ;;  %p650_p4 = scmp.lt.s32.totalorder %s31_s16, %s31_s16 }
   0xc   :  { %p646_p3 = scmp.ne.s32.totalorder %s31_s16, %s645_s26  ;;  %p651_p5 = scmp.lt.s32.totalorder %s645_s26, %s645_s26 }
   0xe   :  { %p652_p6 = por %p651_p5, %p650_p4 }
  0x10   :  { %p653_p7 = pnand %p652_p6, %p646_p3 }
  0x12   :  { %656 = shalt.err (!%p653_p7)
}
  0x13   :  { %s755_s27 = smov 128   ;;  %s756_s28 = smov 8  }
  0x14   :  { %36 = dma.hbm_to_vmem [thread:$0]  %s875_s1, 2048, %s31_s16, [#allocation6], %s755_s27, %s755_s27, %s756_s28  }
  0x15   :  { %s657_s7 = scalar_lea.hbm %s874_s0, 256 }
  0x16   :  { %p658_p8 = scmp.ne.s32.totalorder %s874_s0, %s657_s7  ;;  %p661_p9 = scmp.lt.u32.totalorder %s657_s7, %s874_s0 }
  0x18   :  { %p663_p10 = pnand %p661_p9, %p658_p8 }
  0x1a   :  { %666 = shalt.err (!%p663_p10)
}
  0x1b   :  { %s667_s12 = scalar_lea.vmem %s785_s18, 256  ;;  %p672_p12 = scmp.lt.s32.totalorder %s785_s18, %s785_s18 }
  0x1c   :  { %p668_p11 = scmp.ne.s32.totalorder %s785_s18, %s667_s12  ;;  %p673_p13 = scmp.lt.s32.totalorder %s667_s12, %s667_s12 }
  0x1e   :  { %p674_p0 = por %p673_p13, %p672_p12 }
  0x20   :  { %p675_p1 = pnand %p674_p0, %p668_p11 }
  0x22   :  { %678 = shalt.err (!%p675_p1)
}
  0x23   :  { %24 = dma.hbm_to_vmem [thread:$0]  %s874_s0, 256, %s785_s18, [#allocation3], %s755_s27, %s755_s27, %s756_s28  }
  0x24   :  { %s757_s14 = smov [#allocation7]   ;;  %s758_s16 = smov [#allocation8]  }
  0x25   :  { %s42_s15 = sshll.u32 %s757_s14, 4  ;;  %s54_s17 = sshll.u32 %s758_s16, 4  ;;  %s43_s15 = int_to_ptr.vmem [resolvable:$true] %s42_s15  ;;  %s822_s17 = int_to_ptr.vmem [resolvable:$true] %s54_s17 }
  0x26   :  { %s679_s21 = scalar_lea.hbm %s876_s2, 2048 }
  0x27   :  { %p680_p2 = scmp.ne.s32.totalorder %s876_s2, %s679_s21  ;;  %p683_p3 = scmp.lt.u32.totalorder %s679_s21, %s876_s2 }
  0x29   :  { %p685_p4 = pnand %p683_p3, %p680_p2 }
  0x2b   :  { %688 = shalt.err (!%p685_p4)
}
  0x2c   :  { %s689_s0 = scalar_lea.vmem %s43_s15, 2048  ;;  %p694_p6 = scmp.lt.s32.totalorder %s43_s15, %s43_s15 }
  0x2d   :  { %p690_p5 = scmp.ne.s32.totalorder %s43_s15, %s689_s0  ;;  %p695_p7 = scmp.lt.s32.totalorder %s689_s0, %s689_s0 }
  0x2f   :  { %p696_p8 = por %p695_p7, %p694_p6 }
  0x31   :  { %p697_p9 = pnand %p696_p8, %p690_p5 }
  0x33   :  { %700 = shalt.err (!%p697_p9)
}
  0x34   :  { %48 = dma.hbm_to_vmem [thread:$0]  %s876_s2, 2048, %s43_s15, [#allocation6], %s755_s27, %s755_s27, %s756_s28  }
  0x35   :  { %s701_s5 = scalar_lea.hbm %s877_s3, 2048 }
  0x36   :  { %p702_p10 = scmp.ne.s32.totalorder %s877_s3, %s701_s5  ;;  %p705_p11 = scmp.lt.u32.totalorder %s701_s5, %s877_s3 }
  0x38   :  { %p707_p12 = pnand %p705_p11, %p702_p10 }
  0x3a   :  { %710 = shalt.err (!%p707_p12)
}
  0x3b   :  { %s711_s10 = scalar_lea.vmem %s822_s17, 2048  ;;  %p716_p0 = scmp.lt.s32.totalorder %s822_s17, %s822_s17 }
  0x3c   :  { %p712_p13 = scmp.ne.s32.totalorder %s822_s17, %s711_s10  ;;  %p717_p1 = scmp.lt.s32.totalorder %s711_s10, %s711_s10 }
  0x3e   :  { %p718_p2 = por %p717_p1, %p716_p0 }
  0x40   :  { %p719_p3 = pnand %p718_p2, %p712_p13 }
  0x42   :  { %722 = shalt.err (!%p719_p3)
}
  0x43   :  { %60 = dma.hbm_to_vmem [thread:$0]  %s877_s3, 2048, %s822_s17, [#allocation9], %s755_s27, %s755_s27, %s756_s28  }
  0x44   :  { %745 = dma.done.wait [#allocation3], 256  }
  0x45   :  { %746 = vsyncadd [#allocation3], 4294967040 }
  0x46   :  { %747 = dma.done.wait [#allocation6], 4096  }
  0x47   :  { %748 = vsyncadd [#allocation6], 4294963200 }
  0x48   :  { %749 = dma.done.wait [#allocation9], 2048  }
  0x49   :  { %750 = vsyncadd [#allocation9], 4294965248  ;;  %v75_v0 = vld [vmem:[#allocation5] sm:$0xff]  ;;  %v76_v1 = vld [vmem:[#allocation5 + $0x8] sm:$0xff]  ;;  %s759_s3 = smov [#allocation10]  }
  0x4a   :  { %v77_v2 = vld [vmem:[#allocation5 + $0x10] sm:$0xff]  ;;  %v532_v3 = vpack.c.bf16 %v76_v1, %v75_v0  ;;  %v78_v4 = vld [vmem:[#allocation5 + $0x18] sm:$0xff]  ;;  %v79_v6 = vld [vmem:[#allocation5 + $0x20] sm:$0xff]  ;;  %s359_s12 = sshll.u32 %s759_s3, 4  ;;  %s360_s12 = int_to_ptr.vmem [resolvable:$true] %s359_s12 }
  0x4b   :  { %v536_v5 = vpack.c.bf16 %v78_v4, %v77_v2  ;;  %v80_v7 = vld [vmem:[#allocation5 + $0x28] sm:$0xff]  ;;  %v81_v9 = vld [vmem:[#allocation5 + $0x30] sm:$0xff]  ;;  %v82_v10 = vld [vmem:[#allocation5 + $0x38] sm:$0xff]  ;;  %s723_s1 = scalar_lea.vmem %s360_s12, 256  ;;  %p728_p5 = scmp.lt.s32.totalorder %s360_s12, %s360_s12 }
  0x4c   :  { %533 = vmatprep.subr.bf16.mxu0 %v532_v3  ;;  %v540_v8 = vpack.c.bf16 %v80_v7, %v79_v6  ;;  %v73_v11 = vld [vmem:[#allocation2] sm:$0xff]  ;;  %v168_v12 = vld [vmem:[#allocation7] sm:$0xff]  ;;  %v169_v13 = vld [vmem:[#allocation7 + $0x8] sm:$0xff]  ;;  %v544_v20 = vpack.c.bf16 %v82_v10, %v81_v9  ;;  %p724_p4 = scmp.ne.s32.totalorder %s360_s12, %s723_s1  ;;  %p729_p6 = scmp.lt.s32.totalorder %s723_s1, %s723_s1 }
  0x4d   :  { %535 = vmatpush3.bf16.msra.mxu0 %v532_v3  ;;  %459 = vmatprep.mubr.f32.mxu0 %v73_v11  ;;  %v170_v14 = vld [vmem:[#allocation7 + $0x10] sm:$0xff]  ;;  %v564_v15 = vpack.c.bf16 %v169_v13, %v168_v12  ;;  %v171_v16 = vld [vmem:[#allocation7 + $0x18] sm:$0xff]  ;;  %v172_v18 = vld [vmem:[#allocation7 + $0x20] sm:$0xff] }
  0x4e   :  { %537 = vmatprep.subr.bf16.mxu0 %v536_v5  ;;  %v568_v17 = vpack.c.bf16 %v171_v16, %v170_v14  ;;  %v173_v19 = vld [vmem:[#allocation7 + $0x28] sm:$0xff]  ;;  %v83_v21 = vld [vmem:[#allocation5 + $0x40] sm:$0xff]  ;;  %v174_v24 = vld [vmem:[#allocation7 + $0x30] sm:$0xff]  ;;  %p730_p7 = por %p729_p6, %p728_p5 }
  0x4f   :  { %565 = vmatprep.subr.bf16.mxu1 %v564_v15  ;;  %v84_v22 = vld [vmem:[#allocation5 + $0x48] sm:$0xff]  ;;  %v572_v23 = vpack.c.bf16 %v173_v19, %v172_v18  ;;  %v175_v25 = vld [vmem:[#allocation7 + $0x38] sm:$0xff]  ;;  %v85_v27 = vld [vmem:[#allocation5 + $0x50] sm:$0xff] }
  0x50   :  { %567 = vmatpush3.bf16.msra.mxu1 %v564_v15  ;;  %v548_v26 = vpack.c.bf16 %v84_v22, %v83_v21  ;;  %v86_v28 = vld [vmem:[#allocation5 + $0x58] sm:$0xff]  ;;  %v576_v29 = vpack.c.bf16 %v175_v25, %v174_v24  ;;  %v176_v30 = vld [vmem:[#allocation7 + $0x40] sm:$0xff]  ;;  %v177_v31 = vld [vmem:[#allocation7 + $0x48] sm:$0xff]  ;;  %p731_p8 = pnand %p730_p7, %p724_p4 }
  0x51   :  { %539 = vmatpush3.bf16.msra.mxu0 %v536_v5  ;;  %569 = vmatprep.subr.bf16.mxu1 %v568_v17  ;;  %v552_v32 = vpack.c.bf16 %v86_v28, %v85_v27  ;;  %v87_v33 = vld [vmem:[#allocation5 + $0x60] sm:$0xff]  ;;  %v88_v34 = vld [vmem:[#allocation5 + $0x68] sm:$0xff]  ;;  %v580_v35 = vpack.c.bf16 %v177_v31, %v176_v30  ;;  %v178_v36 = vld [vmem:[#allocation7 + $0x50] sm:$0xff] }
  0x52   :  { %541 = vmatprep.subr.bf16.mxu0 %v540_v8  ;;  %v179_v37 = vld [vmem:[#allocation7 + $0x58] sm:$0xff]  ;;  %v556_v38 = vpack.c.bf16 %v88_v34, %v87_v33  ;;  %v89_v39 = vld [vmem:[#allocation5 + $0x70] sm:$0xff]  ;;  %v180_v42 = vld [vmem:[#allocation7 + $0x60] sm:$0xff] }
  0x53   :  { %v90_v40 = vld [vmem:[#allocation5 + $0x78] sm:$0xff]  ;;  %v584_v41 = vpack.c.bf16 %v179_v37, %v178_v36  ;;  %v181_v43 = vld [vmem:[#allocation7 + $0x68] sm:$0xff]  ;;  %v182_v47 = vld [vmem:[#allocation7 + $0x70] sm:$0xff] }
  0x54   :  { %571 = vmatpush3.bf16.msra.mxu1 %v568_v17  ;;  %v560_v44 = vpack.c.bf16 %v90_v40, %v89_v39  ;;  %v588_v45 = vpack.c.bf16 %v181_v43, %v180_v42  ;;  %v74_v46 = vld [vmem:[#allocation2 + $0x8] sm:$0xff]  ;;  %v261_v50 = vld [vmem:[#allocation8] sm:$0xff]  ;;  %v262_v51 = vld [vmem:[#allocation8 + $0x8] sm:$0xff] }
  0x55   :  { %543 = vmatpush3.bf16.msra.mxu0 %v540_v8  ;;  %573 = vmatprep.subr.bf16.mxu1 %v572_v23  ;;  %v183_v48 = vld [vmem:[#allocation7 + $0x78] sm:$0xff]  ;;  %v263_v52 = vld [vmem:[#allocation8 + $0x10] sm:$0xff]  ;;  %v596_v53 = vpack.c.bf16 %v262_v51, %v261_v50  ;;  %v265_v56 = vld [vmem:[#allocation8 + $0x20] sm:$0xff] }
  0x56   :  { %545 = vmatprep.subr.bf16.mxu0 %v544_v20  ;;  %v592_v49 = vpack.c.bf16 %v183_v48, %v182_v47  ;;  %v264_v54 = vld [vmem:[#allocation8 + $0x18] sm:$0xff]  ;;  %v266_v57 = vld [vmem:[#allocation8 + $0x28] sm:$0xff]  ;;  %v267_v59 = vld [vmem:[#allocation8 + $0x30] sm:$0xff] }
  0x57   :  { %v600_v55 = vpack.c.bf16 %v264_v54, %v263_v52  ;;  %v604_v58 = vpack.c.bf16 %v266_v57, %v265_v56  ;;  %v268_v60 = vld [vmem:[#allocation8 + $0x38] sm:$0xff]  ;;  %v269_v62 = vld [vmem:[#allocation8 + $0x40] sm:$0xff]  ;;  %v270_v63 = vld [vmem:[#allocation8 + $0x48] sm:$0xff] }
  0x58   :  { %575 = vmatpush3.bf16.msra.mxu1 %v572_v23  ;;  %v608_v61 = vpack.c.bf16 %v268_v60, %v267_v59  ;;  %v612_v0 = vpack.c.bf16 %v270_v63, %v269_v62  ;;  %v271_v1 = vld [vmem:[#allocation8 + $0x50] sm:$0xff]  ;;  %v272_v2 = vld [vmem:[#allocation8 + $0x58] sm:$0xff]  ;;  %v273_v4 = vld [vmem:[#allocation8 + $0x60] sm:$0xff] }
  0x59   :  { %547 = vmatpush3.bf16.msra.mxu0 %v544_v20  ;;  %577 = vmatprep.subr.bf16.mxu1 %v576_v29  ;;  %v616_v3 = vpack.c.bf16 %v272_v2, %v271_v1  ;;  %v274_v5 = vld [vmem:[#allocation8 + $0x68] sm:$0xff]  ;;  %v275_v11 = vld [vmem:[#allocation8 + $0x70] sm:$0xff]  ;;  %v276_v12 = vld [vmem:[#allocation8 + $0x78] sm:$0xff] }
  0x5a   :  { %549 = vmatprep.subr.bf16.mxu0 %v548_v26  ;;  %v620_v6 = vpack.c.bf16 %v274_v5, %v273_v4  ;;  %v624_v13 = vpack.c.bf16 %v276_v12, %v275_v11 }
  0x5c   :  { %579 = vmatpush3.bf16.msra.mxu1 %v576_v29 }
  0x5d   :  { %551 = vmatpush3.bf16.msra.mxu0 %v548_v26  ;;  %581 = vmatprep.subr.bf16.mxu1 %v580_v35 }
  0x5e   :  { %553 = vmatprep.subr.bf16.mxu0 %v552_v32 }
  0x60   :  { %583 = vmatpush3.bf16.msra.mxu1 %v580_v35 }
  0x61   :  { %555 = vmatpush3.bf16.msra.mxu0 %v552_v32  ;;  %585 = vmatprep.subr.bf16.mxu1 %v584_v41 }
  0x62   :  { %557 = vmatprep.subr.bf16.mxu0 %v556_v38 }
  0x64   :  { %587 = vmatpush3.bf16.msra.mxu1 %v584_v41 }
  0x65   :  { %559 = vmatpush3.bf16.msra.mxu0 %v556_v38  ;;  %589 = vmatprep.subr.bf16.mxu1 %v588_v45 }
  0x66   :  { %561 = vmatprep.subr.bf16.mxu0 %v560_v44 }
  0x68   :  { %591 = vmatpush3.bf16.msra.mxu1 %v588_v45 }
  0x69   :  { %563 = vmatpush3.bf16.msra.mxu0 %v560_v44  ;;  %593 = vmatprep.subr.bf16.mxu1 %v592_v49 }
  0x6a   :  { %597 = vmatprep.subr.bf16.mxu0 %v596_v53 }
  0x6c   :  { %460 = vmatmul.mubr.f32.vlgmr.msra.gmra.mrb[0].mxu0 %v74_v46  ;;  %595 = vmatpush3.bf16.msra.mxu1 %v592_v49 }
  0x6d   :  { %599 = vmatpush3.bf16.msra.mxu0 %v596_v53 }
  0x6e   :  { %601 = vmatprep.subr.bf16.mxu0 %v600_v55 }
  0x71   :  { %603 = vmatpush3.bf16.msra.mxu0 %v600_v55 }
  0x72   :  { %605 = vmatprep.subr.bf16.mxu0 %v604_v58 }
  0x75   :  { %607 = vmatpush3.bf16.msra.mxu0 %v604_v58 }
  0x76   :  { %609 = vmatprep.subr.bf16.mxu0 %v608_v61 }
  0x79   :  { %611 = vmatpush3.bf16.msra.mxu0 %v608_v61 }
  0x7a   :  { %613 = vmatprep.subr.bf16.mxu0 %v612_v0 }
  0x7d   :  { %615 = vmatpush3.bf16.msra.mxu0 %v612_v0 }
  0x7e   :  { %617 = vmatprep.subr.bf16.mxu0 %v616_v3 }
  0x81   :  { %619 = vmatpush3.bf16.msra.mxu0 %v616_v3 }
  0x82   :  { %621 = vmatprep.subr.bf16.mxu0 %v620_v6 }
  0x85   :  { %623 = vmatpush3.bf16.msra.mxu0 %v620_v6 }
  0x86   :  { %625 = vmatprep.subr.bf16.mxu0 %v624_v13 }
  0x89   :  { %627 = vmatpush3.bf16.msra.mxu0 %v624_v13 }
 0x13f   :  { %v461_v7 = vpop.f32.mrb[0].mxu0 }
 0x140   :  { %v157_v8 = vpop.f32.mrb[1].mxu0  ;;  %v167_v10 = vmax.f32 %v461_v7, 0.0 }
 0x141   :  { %v166_v9 = vmax.f32 %v157_v8, 0.0 }
 0x143   :  { %494 = vmatprep.mubr.f32.mxu1 %v166_v9 }
 0x144   :  { %495 = vmatmul.mubr.f32.vlgmr.msra.gmra.mrb[0].mxu1 %v167_v10 }
 0x217   :  { %v496_v14 = vpop.f32.mrb[0].mxu1 }
 0x218   :  { %v250_v15 = vpop.f32.mrb[1].mxu1  ;;  %v260_v17 = vmax.f32 %v496_v14, 0.0 }
 0x219   :  { %v259_v16 = vmax.f32 %v250_v15, 0.0 }
 0x21b   :  { %529 = vmatprep.mubr.f32.mxu0 %v259_v16 }
 0x21c   :  { %530 = vmatmul.mubr.f32.vlgmr.msra.gmra.mrb[2].mxu0 %v260_v17 }
 0x2ef   :  { %v531_v18 = vpop.f32.mrb[2].mxu0 }
 0x2f0   :  { %353 = vst [vmem:[#allocation10 + $0x8] sm:$0xff] %v531_v18  ;;  %v343_v19 = vpop.f32.mrb[3].mxu0 }
 0x2f1   :  { %352 = vst [vmem:[#allocation10] sm:$0xff] %v343_v19 }
 0x2f2   :  { %734 = shalt.err (!%p731_p8)
}
 0x2f3   :  { %s735_s15 = scalar_lea.hbm %s878_s4, 256 }
 0x2f4   :  { %p736_p9 = scmp.ne.s32.totalorder %s878_s4, %s735_s15  ;;  %p739_p10 = scmp.lt.u32.totalorder %s735_s15, %s878_s4 }
 0x2f6   :  { %p741_p11 = pnand %p739_p10, %p736_p9 }
 0x2f8   :  { %744 = shalt.err (!%p741_p11)
}
 0x2f9   :  { %365 = dma.vmem_to_hbm [thread:$0]  %s360_s12, 256, %s878_s4, [#allocation4], %s755_s27, %s755_s27, %s756_s28  }
 0x2fa   :  { %751 = dma.done.wait [#allocation4], 256  }
 0x2fb   :  { %752 = vsyncadd [#allocation4], 4294967040 }
 0x2fc   :  { %369 = vsyncpa [#allocation3], 1 }
 0x2fd   :  { %370 = vsyncpa [#allocation6], 1 }
 0x2fe   :  { %371 = vsyncpa [#allocation9], 1 }
 0x2ff   :  { %372 = vsyncpa [#allocation4], 1 }

</bundles_post_ra>
